<compile_context>
chip_gen: v5e
topology: v5e:2x2
jax: 0.10.0
libtpu: 0.0.40
codegen_flags: <defaults>
</compile_context>

<pallas_src>
import math

import jax
import jax.numpy as jnp
from jax.experimental import pallas as pl
from jax.experimental.pallas import tpu as pltpu

_INV_SQRT2 = 1.0 / math.sqrt(2.0)


def _round_up(x, m):
    return (x + m - 1) // m * m


def _gelu_exact_f32(h):
    # Exact GELU (PyTorch nn.GELU default): 0.5 * x * (1 + erf(x / sqrt(2)))
    return 0.5 * h * (1.0 + jax.lax.erf(h * jnp.float32(_INV_SQRT2)))


# ---------------------------------------------------------------------------
# Kernels
# ---------------------------------------------------------------------------
def _fused_head_kernel(x_ref, w1_ref, b1_ref, w2_ref, b2_ref, o_ref, h_ref):
    """Grid (token tile i, vocab tile j).  The hidden activation depends only
    on i, so compute it once per row tile (j == 0) into VMEM scratch and reuse
    it for every vocab tile."""
    @pl.when(pl.program_id(1) == 0)
    def _():
        h = jnp.dot(x_ref[...], w1_ref[...], preferred_element_type=jnp.float32)
        h = _gelu_exact_f32(h + b1_ref[...])
        # Note: storing h in compute_dtype (bf16 default) adds one rounding;
        # pass compute_dtype=jnp.float32 to make_head for the exact path.
        h_ref[...] = h.astype(h_ref.dtype)

    # W2 block is block-major (1, hidden, tn): drop the leading block dim.
    out = jnp.dot(h_ref[...], w2_ref[0], preferred_element_type=jnp.float32)
    o_ref[...] = (out + b2_ref[...]).astype(o_ref.dtype)


def _hidden_kernel(x_ref, w1_ref, b1_ref, h_ref):
    """Stage 1 of the two-stage fallback: H = GELU(x @ W1 + b1), hidden-tiled."""
    h = jnp.dot(x_ref[...], w1_ref[...], preferred_element_type=jnp.float32)
    h = _gelu_exact_f32(h + b1_ref[...])
    h_ref[...] = h.astype(h_ref.dtype)


def _out_kernel(h_ref, w2_ref, b2_ref, o_ref, acc_ref):
    """Stage 2 of the two-stage fallback: out = H @ W2 + b2 (hidden reduction)."""
    @pl.when(pl.program_id(2) == 0)
    def _():
        acc_ref[...] = jnp.zeros_like(acc_ref)

    acc_ref[...] += jnp.dot(h_ref[...], w2_ref[...],
                            preferred_element_type=jnp.float32)

    @pl.when(pl.program_id(2) == pl.num_programs(2) - 1)
    def _():
        o_ref[...] = (acc_ref[...] + b2_ref[...]).astype(o_ref.dtype)


# ---------------------------------------------------------------------------
# Per-generation configuration
# ---------------------------------------------------------------------------
_GEN_CFG = {
    # tm: token tile, tn: vocab tile, thk: hidden tile (fallback path),
    # vmem: vmem_limit_bytes handed to the Mosaic compiler.
    "v5e":     dict(tm=512,  tn=512, thk=512, vmem=100 * 1024 * 1024),
    "v6e":     dict(tm=1024, tn=512, thk=512, vmem=100 * 1024 * 1024),
    "v7x":     dict(tm=512,  tn=256, thk=512, vmem=52 * 1024 * 1024),
    "default": dict(tm=512,  tn=256, thk=512, vmem=48 * 1024 * 1024),
}


def _tpu_generation():
    try:
        kind = jax.devices()[0].device_kind.lower()
    except Exception:
        return "default"
    if "v7" in kind:
        return "v7x"
    if "v6" in kind:
        return "v6e"
    if "v5 lite" in kind or "v5e" in kind or "v5litepod" in kind:
        return "v5e"
    return "default"


def _const_block_spec(block_shape, index_map):
    """BlockSpec whose block index never changes: single-buffer it so the
    pipeline does not allocate a useless second VMEM copy."""
    try:
        return pl.BlockSpec(block_shape, index_map, pipeline_mode=pl.Buffered(1))
    except (TypeError, AttributeError):  # older jax without pipeline_mode
        return pl.BlockSpec(block_shape, index_map)


def _fused_vmem_bytes(tm, tn, d_model, hidden, cd_size):
    """Rough VMEM footprint of the fused kernel (output counted as f32)."""
    return (2 * tm * d_model * cd_size        # x blocks (double-buffered)
            + d_model * hidden * cd_size      # W1, single-buffered, resident
            + _round_up(hidden, 128) * 4      # b1
            + 2 * hidden * tn * cd_size       # W2 blocks (double-buffered)
            + 2 * tn * 4                      # b2 blocks
            + tm * hidden * cd_size           # h scratch
            + 2 * tm * tn * 4)                # out blocks (double-buffered)


# ---------------------------------------------------------------------------
# One-time prep + forward
# ---------------------------------------------------------------------------
def make_head(w1, b1, w2, b2, *, compute_dtype=jnp.bfloat16, out_dtype=None,
              tm=None, tn=None, thk=None, force_two_stage=False):
    """One-time weight prep (pad + cast + block-major reshape) and tile
    selection.  Returns forward(x: [B,S,d_model]) -> [B,S,voc].

    compute_dtype: MXU operand dtype (bf16 default); accumulation, biases and
      GELU stay float32.  out_dtype: logits dtype, defaults to x.dtype (pass
      jnp.bfloat16 to halve output writeback if the consumer accepts it).
    """
    d_model, hidden = w1.shape
    hidden_w, voc = w2.shape
    assert hidden_w == hidden and b1.shape == (hidden,) and b2.shape == (voc,)

    cfg = _GEN_CFG[_tpu_generation()]
    tm = int(tm or cfg["tm"])
    tn = int(tn or cfg["tn"])
    thk = int(thk or cfg["thk"])
    vmem_limit = cfg["vmem"]
    cd_size = jnp.dtype(compute_dtype).itemsize

    # Lane-dense vocab tile (multiple of 128 -> unmasked output stores).
    tn = min(tn, _round_up(voc, 128))
    voc_pad = _round_up(voc, tn)

    # ---- path selection ----------------------------------------------------
    # The fused path keeps W1 and a (tm, hidden) activation scratch fully VMEM
    # resident.  If that does not fit the per-generation budget (large hidden
    # = voc // 3), fall back to a two-stage hidden-tiled head.
    use_fused = not force_two_stage
    if use_fused:
        while (tm > 256 and
               _fused_vmem_bytes(tm, tn, d_model, hidden, cd_size)
               > 0.8 * vmem_limit):
            tm //= 2
        use_fused = (_fused_vmem_bytes(tm, tn, d_model, hidden, cd_size)
                     <= 0.8 * vmem_limit)

    # =========================================================================
    # Fused path: one pallas_call, W1 resident, h reused across vocab tiles.
    # =========================================================================
    if use_fused:
        # One-time weight prep (kept out of the per-call hot path).
        w1c = w1.astype(compute_dtype)
        b1c = b1.reshape(1, hidden).astype(jnp.float32)
        w2p = jnp.pad(w2, ((0, 0), (0, voc_pad - voc)))
        # Block-major W2: one contiguous DMA per vocab tile.
        w2c = (w2p.astype(compute_dtype)
               .reshape(hidden, voc_pad // tn, tn)
               .transpose(1, 0, 2))
        b2c = jnp.pad(b2, (0, voc_pad - voc)).reshape(1, voc_pad).astype(jnp.float32)

        def forward(x):
            B, S, dm = x.shape
            assert dm == d_model
            odt = out_dtype if out_dtype is not None else x.dtype
            N = B * S
            tm_c = min(tm, _round_up(N, 8))
            n_pad = _round_up(N, tm_c)

            x2d = x.reshape(N, d_model)
            if n_pad != N:
                x2d = jnp.pad(x2d, ((0, n_pad - N), (0, 0)))
            x2d = x2d.astype(compute_dtype)

            grid = (n_pad // tm_c, voc_pad // tn)
            n_row_tiles = grid[0]
            cost = pl.CostEstimate(
                flops=2 * n_pad * d_model * hidden + 2 * n_pad * hidden * voc_pad,
                transcendentals=n_pad * hidden,
                # W2 (the dominant stream) is re-read once per token tile.
                bytes_accessed=(x2d.size * cd_size
                                + w1c.size * cd_size + b1c.size * 4
                                + n_row_tiles * (w2c.size * cd_size + b2c.size * 4)
                                + n_pad * voc_pad * jnp.dtype(odt).itemsize),
            )

            out2d = pl.pallas_call(
                _fused_head_kernel,
                out_shape=jax.ShapeDtypeStruct((n_pad, voc_pad), odt),
                grid_spec=pltpu.PrefetchScalarGridSpec(
                    num_scalar_prefetch=0,
                    grid=grid,
                    in_specs=[
                        pl.BlockSpec((tm_c, d_model), lambda i, j: (i, 0)),
                        # Constant-index blocks -> single-buffered (saves one
                        # full W1 copy of VMEM).
                        _const_block_spec((d_model, hidden), lambda i, j: (0, 0)),
                        _const_block_spec((1, hidden), lambda i, j: (0, 0)),
                        # Block-major W2: block j is one contiguous slab.
                        pl.BlockSpec((1, hidden, tn), lambda i, j: (j, 0, 0)),
                        pl.BlockSpec((1, tn), lambda i, j: (0, j)),
                    ],
                    out_specs=pl.BlockSpec((tm_c, tn), lambda i, j: (i, j)),
                    scratch_shapes=[pltpu.VMEM((tm_c, hidden), compute_dtype)],
                ),
                compiler_params=pltpu.CompilerParams(
                    # Token tiles independent -> megacore-shardable; vocab axis
                    # reuses the per-row-tile h scratch -> "arbitrary".
                    dimension_semantics=("parallel", "arbitrary"),
                    vmem_limit_bytes=vmem_limit,
                ),
                cost_estimate=cost,
            )(x2d, w1c, b1c, w2c, b2c)

            return out2d[:N, :voc].reshape(B, S, voc)

        return forward

    # =========================================================================
    # Two-stage fallback: hidden axis tiled, H materialized to HBM.
    # =========================================================================
    thk = min(thk, _round_up(hidden, 128))
    hidden_pad = _round_up(hidden, thk)

    # One-time weight prep.  Padded hidden columns have zero W1/b1 so their
    # GELU output is exactly 0 and (with zero-padded W2 rows) contributes 0.
    w1c = jnp.pad(w1, ((0, 0), (0, hidden_pad - hidden))).astype(compute_dtype)
    b1c = (jnp.pad(b1, (0, hidden_pad - hidden))
           .reshape(1, hidden_pad).astype(jnp.float32))
    w2c = jnp.pad(w2, ((0, hidden_pad - hidden), (0, voc_pad - voc))).astype(compute_dtype)
    b2c = jnp.pad(b2, (0, voc_pad - voc)).reshape(1, voc_pad).astype(jnp.float32)

    def forward(x):
        B, S, dm = x.shape
        assert dm == d_model
        odt = out_dtype if out_dtype is not None else x.dtype
        N = B * S
        tm_c = min(tm, _round_up(N, 8))
        n_pad = _round_up(N, tm_c)

        x2d = x.reshape(N, d_model)
        if n_pad != N:
            x2d = jnp.pad(x2d, ((0, n_pad - N), (0, 0)))
        x2d = x2d.astype(compute_dtype)

        # Stage 1: H = GELU(x @ W1 + b1), hidden axis tiled.
        h = pl.pallas_call(
            _hidden_kernel,
            out_shape=jax.ShapeDtypeStruct((n_pad, hidden_pad), compute_dtype),
            grid_spec=pltpu.PrefetchScalarGridSpec(
                num_scalar_prefetch=0,
                grid=(n_pad // tm_c, hidden_pad // thk),
                in_specs=[
                    pl.BlockSpec((tm_c, d_model), lambda i, k: (i, 0)),
                    pl.BlockSpec((d_model, thk), lambda i, k: (0, k)),
                    pl.BlockSpec((1, thk), lambda i, k: (0, k)),
                ],
                out_specs=pl.BlockSpec((tm_c, thk), lambda i, k: (i, k)),
            ),
            compiler_params=pltpu.CompilerParams(
                dimension_semantics=("parallel", "parallel"),
                vmem_limit_bytes=vmem_limit,
            ),
        )(x2d, w1c, b1c)

        # Stage 2: out = H @ W2 + b2 (k = hidden reduction, innermost axis).
        out2d = pl.pallas_call(
            _out_kernel,
            out_shape=jax.ShapeDtypeStruct((n_pad, voc_pad), odt),
            grid_spec=pltpu.PrefetchScalarGridSpec(
                num_scalar_prefetch=0,
                grid=(n_pad // tm_c, voc_pad // tn, hidden_pad // thk),
                in_specs=[
                    pl.BlockSpec((tm_c, thk), lambda i, j, k: (i, k)),
                    pl.BlockSpec((thk, tn), lambda i, j, k: (k, j)),
                    pl.BlockSpec((1, tn), lambda i, j, k: (0, j)),
                ],
                out_specs=pl.BlockSpec((tm_c, tn), lambda i, j, k: (i, j)),
                scratch_shapes=[pltpu.VMEM((tm_c, tn), jnp.float32)],
            ),
            compiler_params=pltpu.CompilerParams(
                dimension_semantics=("parallel", "parallel", "arbitrary"),
                vmem_limit_bytes=vmem_limit,
            ),
        )(h, w2c, b2c)

        return out2d[:N, :voc].reshape(B, S, voc)

    return forward


# ---------------------------------------------------------------------------
# Reference / init (match PyTorch Head.init_weights)
# ---------------------------------------------------------------------------
def init_head_params(key, d_model, voc_size):
    """xavier_normal_ for weight matrices, zeros for biases (Head.init_weights)."""
    hidden = voc_size // 3
    k1, k2 = jax.random.split(key)

    def xavier_normal(k, fan_in, fan_out):
        std = math.sqrt(2.0 / (fan_in + fan_out))
        return jax.random.normal(k, (fan_in, fan_out), dtype=jnp.float32) * std

    w1 = xavier_normal(k1, d_model, hidden)
    b1 = jnp.zeros((hidden,), dtype=jnp.float32)
    w2 = xavier_normal(k2, hidden, voc_size)
    b2 = jnp.zeros((voc_size,), dtype=jnp.float32)
    return w1, b1, w2, b2


def head_reference(x, w1, b1, w2, b2):
    h = x @ w1 + b1
    h = jax.nn.gelu(h, approximate=False)
    return h @ w2 + b2


if __name__ == "__main__":
    # Small shapes consistent with the module's forward:
    # x: [batch=2, seq=8, d_model=32], voc_size=48 -> hidden = voc_size // 3 = 16
    B, S, d_model, voc_size = 2, 8, 32, 48

    key = jax.random.PRNGKey(0)
    kx, kp = jax.random.split(key)
    x = jax.random.normal(kx, (B, S, d_model), dtype=jnp.float32)
    w1, b1, w2, b2 = init_head_params(kp, d_model, voc_size)

    ref = head_reference(x, w1, b1, w2, b2)

    # Fused path, full f32: tight check against the pure-JAX reference.
    head_f32 = make_head(w1, b1, w2, b2, compute_dtype=jnp.float32)
    out_f32 = jax.block_until_ready(head_f32(x))
    assert out_f32.shape == (B, S, voc_size)
    assert jnp.allclose(out_f32, ref, atol=1e-5, rtol=1e-5), "f32 fused mismatch"

    # Fused path, default bf16 MXU operands (f32 accumulation): looser tol.
    head_bf16 = make_head(w1, b1, w2, b2)
    out_bf16 = jax.block_until_ready(head_bf16(x))
    assert out_bf16.shape == (B, S, voc_size)
    assert jnp.allclose(out_bf16, ref, atol=5e-2, rtol=5e-2), "bf16 fused mismatch"

    # Two-stage (hidden-tiled) fallback, forced at small shapes, f32: exact.
    head_2s = make_head(w1, b1, w2, b2, compute_dtype=jnp.float32,
                        force_two_stage=True)
    out_2s = jax.block_until_ready(head_2s(x))
    assert out_2s.shape == (B, S, voc_size)
    assert jnp.allclose(out_2s, ref, atol=1e-5, rtol=1e-5), "two-stage mismatch"

    print("KERNEL_OK")
</pallas_src>

<mosaic_0001>
module attributes {stable_mosaic.version = 11 : i64} {
  func.func @_fused_head_kernel(%arg0: i32, %arg1: i32, %arg2: memref<16x32xf32, #tpu.memory_space<vmem>>, %arg3: memref<32x16xf32, #tpu.memory_space<vmem>>, %arg4: memref<1x16xf32, #tpu.memory_space<vmem>>, %arg5: memref<1x16x128xf32, #tpu.memory_space<vmem>>, %arg6: memref<1x128xf32, #tpu.memory_space<vmem>>, %arg7: memref<16x128xf32, #tpu.memory_space<vmem>>, %arg8: memref<16x16xf32, #tpu.memory_space<vmem>>) attributes {dimension_semantics = [#tpu.dimension_semantics<parallel>, #tpu.dimension_semantics<arbitrary>], iteration_bounds = array<i64: 1, 1>, scalar_prefetch = 0 : i64, scratch_operands = 1 : i64, tpu.core_type = #tpu.core_type<tc>, window_params = [{transform_indices = @transform_0, window_bounds = array<i64: 16, 32>}, {pipeline_mode = #tpu.pipeline_mode<synchronous>, transform_indices = @transform_1, window_bounds = array<i64: 32, 16>}, {pipeline_mode = #tpu.pipeline_mode<synchronous>, transform_indices = @transform_2, window_bounds = array<i64: 1, 16>}, {transform_indices = @transform_3, window_bounds = array<i64: 1, 16, 128>}, {transform_indices = @transform_4, window_bounds = array<i64: 1, 128>}, {transform_indices = @transform_5, window_bounds = array<i64: 16, 128>}]} {
    %c0_i32 = arith.constant 0 : i32
    %0 = arith.cmpi eq, %arg1, %c0_i32 : i32
    %1 = arith.extui %0 : i1 to i32
    %c0_i32_0 = arith.constant 0 : i32
    %2 = arith.cmpi ne, %1, %c0_i32_0 : i32
    scf.if %2 {
      %c0_9 = arith.constant 0 : index
      %c0_10 = arith.constant 0 : index
      %11 = vector.load %arg2[%c0_9, %c0_10] : memref<16x32xf32, #tpu.memory_space<vmem>>, vector<16x32xf32>
      %c0_11 = arith.constant 0 : index
      %c0_12 = arith.constant 0 : index
      %12 = vector.load %arg3[%c0_11, %c0_12] : memref<32x16xf32, #tpu.memory_space<vmem>>, vector<32x16xf32>
      %cst_13 = arith.constant dense<0.000000e+00> : vector<16x16xf32>
      %13 = tpu.matmul %11, %12, %cst_13 {dimension_numbers = #tpu.dot_dimension_numbers<[1], [0], [0], [1], [0, 0, 1, 1], [], []>} : vector<16x32xf32>, vector<32x16xf32>, vector<16x16xf32> -> vector<16x16xf32>
      %c0_14 = arith.constant 0 : index
      %c0_15 = arith.constant 0 : index
      %14 = vector.load %arg4[%c0_14, %c0_15] : memref<1x16xf32, #tpu.memory_space<vmem>>, vector<1x16xf32>
      %15 = vector.broadcast %14 : vector<1x16xf32> to vector<16x16xf32>
      %16 = arith.addf %13, %15 : vector<16x16xf32>
      %cst_16 = arith.constant 5.000000e-01 : f32
      %17 = vector.broadcast %cst_16 : f32 to vector<16x16xf32>
      %18 = arith.mulf %17, %16 : vector<16x16xf32>
      %cst_17 = arith.constant 0.707106769 : f32
      %19 = vector.broadcast %cst_17 : f32 to vector<16x16xf32>
      %20 = arith.mulf %16, %19 : vector<16x16xf32>
      %21 = math.erf %20 : vector<16x16xf32>
      %cst_18 = arith.constant 1.000000e+00 : f32
      %22 = vector.broadcast %cst_18 : f32 to vector<16x16xf32>
      %23 = arith.addf %22, %21 : vector<16x16xf32>
      %24 = arith.mulf %18, %23 : vector<16x16xf32>
      %c0_19 = arith.constant 0 : index
      %c0_20 = arith.constant 0 : index
      %25 = vector.load %arg8[%c0_19, %c0_20] : memref<16x16xf32, #tpu.memory_space<vmem>>, vector<16x16xf32>
      tpu.vector_store %arg8[%c0_19, %c0_20], %24 {strides = array<i32>} : memref<16x16xf32, #tpu.memory_space<vmem>>, vector<16x16xf32>,
    } else {
    }
    %c0 = arith.constant 0 : index
    %c0_1 = arith.constant 0 : index
    %3 = vector.load %arg8[%c0, %c0_1] : memref<16x16xf32, #tpu.memory_space<vmem>>, vector<16x16xf32>
    %c0_2 = arith.constant 0 : index
    %c0_3 = arith.constant 0 : index
    %c0_4 = arith.constant 0 : index
    %4 = vector.load %arg5[%c0_2, %c0_3, %c0_4] : memref<1x16x128xf32, #tpu.memory_space<vmem>>, vector<1x16x128xf32>
    %5 = vector.shape_cast %4 : vector<1x16x128xf32> to vector<16x128xf32>
    %cst = arith.constant dense<0.000000e+00> : vector<16x128xf32>
    %6 = tpu.matmul %3, %5, %cst {dimension_numbers = #tpu.dot_dimension_numbers<[1], [0], [0], [1], [0, 0, 1, 1], [], []>} : vector<16x16xf32>, vector<16x128xf32>, vector<16x128xf32> -> vector<16x128xf32>
    %c0_5 = arith.constant 0 : index
    %c0_6 = arith.constant 0 : index
    %7 = vector.load %arg6[%c0_5, %c0_6] : memref<1x128xf32, #tpu.memory_space<vmem>>, vector<1x128xf32>
    %8 = vector.broadcast %7 : vector<1x128xf32> to vector<16x128xf32>
    %9 = arith.addf %6, %8 : vector<16x128xf32>
    %c0_7 = arith.constant 0 : index
    %c0_8 = arith.constant 0 : index
    %10 = vector.load %arg7[%c0_7, %c0_8] : memref<16x128xf32, #tpu.memory_space<vmem>>, vector<16x128xf32>
    tpu.vector_store %arg7[%c0_7, %c0_8], %9 {strides = array<i32>} : memref<16x128xf32, #tpu.memory_space<vmem>>, vector<16x128xf32>,
    return
  }
  func.func @transform_0(%arg0: i32, %arg1: i32) -> (i32, i32) {
    %c0_i32 = arith.constant 0 : i32
    %c0_i32_0 = arith.constant 0 : i32
    return %arg0, %c0_i32 : i32, i32
  }
  func.func @transform_1(%arg0: i32, %arg1: i32) -> (i32, i32) {
    %c0_i32 = arith.constant 0 : i32
    %c0_i32_0 = arith.constant 0 : i32
    %c0_i32_1 = arith.constant 0 : i32
    return %c0_i32, %c0_i32_0 : i32, i32
  }
  func.func @transform_2(%arg0: i32, %arg1: i32) -> (i32, i32) {
    %c0_i32 = arith.constant 0 : i32
    %c0_i32_0 = arith.constant 0 : i32
    %c0_i32_1 = arith.constant 0 : i32
    return %c0_i32, %c0_i32_0 : i32, i32
  }
  func.func @transform_3(%arg0: i32, %arg1: i32) -> (i32, i32, i32) {
    %c0_i32 = arith.constant 0 : i32
    %c0_i32_0 = arith.constant 0 : i32
    %c0_i32_1 = arith.constant 0 : i32
    return %arg1, %c0_i32, %c0_i32_0 : i32, i32, i32
  }
  func.func @transform_4(%arg0: i32, %arg1: i32) -> (i32, i32) {
    %c0_i32 = arith.constant 0 : i32
    %c0_i32_0 = arith.constant 0 : i32
    return %c0_i32, %arg1 : i32, i32
  }
  func.func @transform_5(%arg0: i32, %arg1: i32) -> (i32, i32) {
    %c0_i32 = arith.constant 0 : i32
    return %arg0, %arg1 : i32, i32
  }
}

</mosaic_0001>

<bundles_post_ra>
// kernel: tpu_custom_call.1
= control target key start
LH: loop header
LB: loop body
LE: loop exit
PB: predicated region body
PF: predicated region fallthrough
CT: control target
= control target key end

     0   :  { %s345_s0 = inlined_call_operand.vmem [shape: f32[16,32], index: 0, kind: input, shape index: {}]   ;;  %s346_s1 = inlined_call_operand.vmem [shape: f32[32,16], index: 1, kind: input, shape index: {}]   ;;  %s347_s2 = inlined_call_operand.vmem [shape: f32[1,16], index: 2, kind: input, shape index: {}]   ;;  %s348_s3 = inlined_call_operand.vmem [shape: f32[1,16,128], index: 3, kind: input, shape index: {}]   ;;  %s349_s4 = inlined_call_operand.vmem [shape: f32[1,128], index: 4, kind: input, shape index: {}]   ;;  %s350_s5 = inlined_call_operand.hbm [shape: f32[16,128], index: 5, kind: output, shape index: {}]  }
   0x1   :  { %v30_v0 = vld [vmem:[%s346_s1 + $0x18] sm:$0xff]  ;;  %v29_v1 = vld [vmem:[%s346_s1 + $0x10] sm:$0xff]  ;;  %v28_v2 = vld [vmem:[%s346_s1 + $0x8] sm:$0xff] }
   0x2   :  { %54 = vmatpush.msra.mxu0 %v30_v0  ;;  %220 = vmatpush.msra.mxu2 %v30_v0 }
   0x4   :  { %55 = vmatpush.msra.mxu0 %v29_v1  ;;  %221 = vmatpush.msra.mxu2 %v29_v1 }
   0x5   :  { %10 = vsyncpa [#allocation4], 0  ;;  %v27_v3 = vld [vmem:[%s346_s1] sm:$0xff]  ;;  %vm35_vm0 = vcmask 261120   ;;  %v26_v5 = vld [vmem:[%s345_s0 + $0x8] sm:$0xff]  ;;  %vm153_vm9 = vcmask 130048  }
   0x6   :  { %56 = vmatpush.msra.mxu0 %v28_v2  ;;  %222 = vmatpush.msra.mxu2 %v28_v2  ;;  %v25_v4 = vld [vmem:[%s345_s0] sm:$0xff]  ;;  %v159_v44 = vld [vmem:[%s348_s3 + $0x8] sm:$0xff]  ;;  %s261_s9 = smov [#allocation3]   ;;  %s202_s13 = sshll.u32 %s350_s5, 4  ;;  %s203_s13 = int_to_ptr.hbm [resolvable:$true] %s202_s13 }
   0x7   :  { %v229_v6 = vld [vmem:[%s347_s2] ss:$0 sm:$0xff]  ;;  %185 = vmatpush.msra.mxu1 %v159_v44  ;;  %224 = vmatpush.msra.mxu3 %v159_v44  ;;  %s200_s10 = sshll.u32 %s261_s9, 4  ;;  %s262_s14 = smov 128   ;;  %s201_s10 = int_to_ptr.vmem [resolvable:$true] %s200_s10 }
   0x8   :  { %57 = vmatpush.msra.mxu0 %v27_v3  ;;  %223 = vmatpush.msra.mxu2 %v27_v3  ;;  %v158_v45 = vld [vmem:[%s348_s3] sm:$0xff]  ;;  %s263_s15 = smov 8  }
   0x9   :  { %214 = vmatmul.msk.f32.vlgmr.msra.gmra.mxu0 %vm35_vm0, %v25_v4  ;;  %215 = vmatmul.msk.f32.vlgmr.msra.gmra.mxu2 %vm35_vm0, %v26_v5 }
   0xa   :  { %186 = vmatpush.msra.mxu1 %v158_v45  ;;  %225 = vmatpush.msra.mxu3 %v158_v45 }
  0x86   :  { %v59_v7 = vpop.f32.mrf.mxu0 }
  0x87   :  { %v315_v8 = vadd.f32 %v229_v6, %v59_v7 }
  0x89   :  { %v318_v9 = vmul.f32 0.70710677, %v315_v8 }
  0x8b   :  { %v69_v10 = vmul.f32 %v318_v9, %v318_v9 }
  0x8c   :  { %v62_v11 = vpop.f32.mrf.mxu2 }
  0x8d   :  { %v70_v12 = vmin.f32 %v69_v10, 16.0  ;;  %v322_v13 = vadd.f32 %v229_v6, %v62_v11 }
  0x8f   :  { %v71_v14 = vmul.f32 2.1237322e-06, %v70_v12  ;;  %v82_v15 = vmul.f32 3.8918573e-05, %v70_v12  ;;  %v325_v16 = vmul.f32 0.70710677, %v322_v13 }
  0x91   :  { %v72_v17 = vadd.f32 0.00028619796, %v71_v14  ;;  %v83_v18 = vadd.f32 0.001143296, %v82_v15  ;;  %v109_v19 = vmul.f32 %v325_v16, %v325_v16 }
  0x93   :  { %v73_v20 = vmul.f32 %v72_v17, %v70_v12  ;;  %v84_v21 = vmul.f32 %v83_v18, %v70_v12  ;;  %v110_v22 = vmin.f32 %v109_v19, 16.0  ;;  %v65_v19 = vmul.f32 0.5, %v315_v8 }
  0x95   :  { %v85_v23 = vadd.f32 0.014752088, %v84_v21  ;;  %v74_v24 = vadd.f32 0.0036580483, %v73_v20  ;;  %v111_v25 = vmul.f32 2.1237322e-06, %v110_v22 }
  0x96   :  { %v122_v26 = vmul.f32 3.8918573e-05, %v110_v22 }
  0x97   :  { %v86_v27 = vmul.f32 %v85_v23, %v70_v12  ;;  %v112_v28 = vadd.f32 0.00028619796, %v111_v25  ;;  %v75_v31 = vmul.f32 %v74_v24, %v70_v12 }
  0x98   :  { %v123_v29 = vadd.f32 0.001143296, %v122_v26 }
  0x99   :  { %v87_v30 = vadd.f32 0.112945676, %v86_v27  ;;  %v113_v32 = vmul.f32 %v112_v28, %v110_v22  ;;  %v76_v38 = vadd.f32 0.05243302, %v75_v31  ;;  %v66_v27 = vmul.f32 0.5, %v322_v13 }
  0x9a   :  { %v124_v33 = vmul.f32 %v123_v29, %v110_v22 }
  0x9b   :  { %v88_v34 = vmul.f32 %v87_v30, %v70_v12  ;;  %v114_v37 = vadd.f32 0.0036580483, %v113_v32  ;;  %v77_v46 = vmul.f32 %v76_v38, %v70_v12 }
  0x9c   :  { %v125_v35 = vadd.f32 0.014752088, %v124_v33 }
  0x9d   :  { %v89_v36 = vadd.f32 0.4994258, %v88_v34  ;;  %v115_v43 = vmul.f32 %v114_v37, %v110_v22  ;;  %v78_v50 = vadd.f32 0.18741608, %v77_v46 }
  0x9e   :  { %v126_v39 = vmul.f32 %v125_v35, %v110_v22 }
  0x9f   :  { %v90_v40 = vmul.f32 %v89_v36, %v70_v12  ;;  %v116_v49 = vadd.f32 0.05243302, %v115_v43  ;;  %v79_v55 = vmul.f32 %v78_v50, %v70_v12 }
  0xa0   :  { %v127_v41 = vadd.f32 0.112945676, %v126_v39 }
  0xa1   :  { %v91_v42 = vadd.f32 1.0, %v90_v40  ;;  %v117_v54 = vmul.f32 %v116_v49, %v110_v22  ;;  %v80_v60 = vadd.f32 1.1283791, %v79_v55 }
  0xa2   :  { %v128_v47 = vmul.f32 %v127_v41, %v110_v22 }
  0xa3   :  { %231 = vrcp.f32 %v91_v42  ;;  %v103_v58 = vand.u32 2147483648, %v91_v42  ;;  %v118_v59 = vadd.f32 0.18741608, %v117_v54  ;;  %v101_v62 = vand.u32 2147483647, %v91_v42 }
  0xa4   :  { %v129_v48 = vadd.f32 0.4994258, %v128_v47  ;;  %vm97_vm2 = vweird.f32 %v91_v42  ;;  %v81_v4 = vmul.f32 %v80_v60, %v318_v9 }
  0xa5   :  { %v104_v1 = vor.u32 1.1754944e-38, %v103_v58  ;;  %v119_v2 = vmul.f32 %v118_v59, %v110_v22  ;;  %vm102_vm4 = vcmp.eq.f32.partialorder %v101_v62, 8.507059e+37 }
  0xa6   :  { %v130_v51 = vmul.f32 %v129_v48, %v110_v22 }
  0xa7   :  { %v120_v12 = vadd.f32 1.1283791, %v119_v2 }
  0xa8   :  { %v131_v52 = vadd.f32 1.0, %v130_v51 }
  0xa9   :  { %v232_v53 = vpop.eup %231  ;;  %v121_v9 = vmul.f32 %v120_v12, %v325_v16  ;;  %v230_v16 = vld [vmem:[%s349_s4] ss:$0 sm:$0xff] }
  0xaa   :  { %v93_v56 = vmul.f32 %v232_v53, %v91_v42  ;;  %233 = vrcp.f32 %v131_v52  ;;  %vm98_vm1 = vweird.f32 %v232_v53  ;;  %v143_v11 = vand.u32 2147483648, %v131_v52 }
  0xab   :  { %vm99_vm3 = vmor %vm97_vm2, %vm98_vm1  ;;  %v141_v15 = vand.u32 2147483647, %v131_v52  ;;  %vm137_vm6 = vweird.f32 %v131_v52 }
  0xac   :  { %v94_v57 = vsub.f32 1.0, %v93_v56  ;;  %v144_v21 = vor.u32 1.1754944e-38, %v143_v11 }
  0xad   :  { %vm142_vm8 = vcmp.eq.f32.partialorder %v141_v15, 8.507059e+37 }
  0xae   :  { %v95_v61 = vmul.f32 %v232_v53, %v94_v57 }
  0xb0   :  { %v234_v63 = vpop.eup %233  ;;  %v96_v0 = vadd.f32 %v232_v53, %v95_v61 }
  0xb1   :  { %v133_v3 = vmul.f32 %v234_v63, %v131_v52  ;;  %vm138_vm5 = vweird.f32 %v234_v63 }
  0xb2   :  { %v100_v5 = vsel %vm99_vm3, %v232_v53, %v96_v0  ;;  %vm139_vm7 = vmor %vm137_vm6, %vm138_vm5 }
  0xb3   :  { %v105_v6 = vsel %vm102_vm4, %v104_v1, %v100_v5  ;;  %v134_v7 = vsub.f32 1.0, %v133_v3 }
  0xb4   :  { %v106_v10 = vmul.f32 %v105_v6, %v81_v4 }
  0xb5   :  { %v135_v14 = vmul.f32 %v234_v63, %v134_v7 }
  0xb6   :  { %v216_v17 = vclamps-f32 %v106_v10, 1.0 }
  0xb7   :  { %v136_v18 = vadd.f32 %v234_v63, %v135_v14 }
  0xb8   :  { %v149_v20 = vadd.f32 1.0, %v216_v17 }
  0xb9   :  { %v140_v22 = vsel %vm139_vm7, %v234_v63, %v136_v18 }
  0xba   :  { %v151_v23 = vmul.f32 %v149_v20, %v65_v19  ;;  %v145_v24 = vsel %vm142_vm8, %v144_v21, %v140_v22 }
  0xbb   :  { %v146_v25 = vmul.f32 %v145_v24, %v121_v9 }
  0xbc   :  { %154 = vst.msk [vmem:[#allocation2] sm:$0xff] %vm153_vm9, %v151_v23 }
  0xbd   :  { %v217_v26 = vclamps-f32 %v146_v25, 1.0 }
  0xbf   :  { %v150_v28 = vadd.f32 1.0, %v217_v26 }
  0xc1   :  { %v152_v29 = vmul.f32 %v150_v28, %v66_v27 }
  0xc3   :  { %155 = vst.msk [vmem:[#allocation2 + $0x8] sm:$0xff] %vm153_vm9, %v152_v29  ;;  %v156_v30 = vld [vmem:[#allocation2] sm:$0xff] }
  0xc4   :  { %218 = vmatmul.msk.f32.vlgmr.msra.gmra.mxu1 %vm153_vm9, %v156_v30 }
  0xca   :  { %v157_v8 = vld [vmem:[#allocation2 + $0x8] sm:$0xff] }
  0xcb   :  { %219 = vmatmul.msk.f32.vlgmr.msra.gmra.mxu3 %vm153_vm9, %v157_v8 }
 0x141   :  { %v188_v31 = vpop.f32.mrf.mxu1 }
 0x142   :  { %v189_v32 = vadd.f32 %v230_v16, %v188_v31 }
 0x144   :  { %194 = vst [vmem:[#allocation3] sm:$0xff] %v189_v32 }
 0x14e   :  { %v191_v13 = vpop.f32.mrf.mxu3 }
 0x14f   :  { %v192_v33 = vadd.f32 %v230_v16, %v191_v13 }
 0x151   :  { %195 = vst [vmem:[#allocation3 + $0x8] sm:$0xff] %v192_v33 }
 0x152   :  { %208 = dma.vmem_to_hbm [thread:$0]  %s201_s10, 256, %s203_s13, [#allocation4], %s262_s14, %s262_s14, %s263_s15  }
 0x153   :  { %259 = dma.done.wait [#allocation4], 256  }
 0x154   :  { %260 = vsyncadd [#allocation4], 4294967040 }
 0x155   :  { %213 = vsyncpa [#allocation4], 1 }

</bundles_post_ra>
